<compile_context>
chip_gen: v5e
topology: v5e:2x2
jax: 0.10.0
libtpu: 0.0.40
codegen_flags: <defaults>
</compile_context>

<pallas_src>
import jax
import jax.numpy as jnp
from jax import lax
from jax.experimental import pallas as pl
from jax.experimental.pallas import tpu as pltpu


# ----------------------------- fused Pallas kernel ---------------------------

def _edgeconv_fused_kernel(src_ref, dst_ref, edge_ref, hid_ref,
                           w1e_ref, w_hid_ref, w2r_ref, bias_ref, out_ref):
    E = edge_ref.shape[0]
    N = hid_ref.shape[0]
    H1P = w1e_ref.shape[1]          # lane-padded mlp1 width (>=128)
    HOP = out_ref.shape[1]          # lane-padded output width (>=128)

    hid_bf = hid_ref[...]                                        # (N, H) bf16

    # ---- fused hid-side projection: hid @ [W1_hid | W2_hid] (one MXU group) --
    hid_proj = jnp.dot(hid_bf, w_hid_ref[...],
                       preferred_element_type=jnp.float32)       # (N, H1P+HOP)
    proj1 = hid_proj[:, :H1P]            # per-node mlp1 hid contribution
    proj2 = hid_proj[:, H1P:H1P + HOP]   # per-node mlp2 hid contribution

    # ---- gather proj1 rows by src: 0/1 one-hot (E, N) selection matmul ------
    src_col = src_ref[...]                                       # (E, 1) int32
    sel_bf = (lax.broadcasted_iota(jnp.int32, (E, N), 1)
              == src_col).astype(jnp.bfloat16)                   # exact 0/1
    gathered = jnp.dot(sel_bf, proj1.astype(jnp.bfloat16),
                       preferred_element_type=jnp.float32)       # (E, H1P)

    # ---- mlp1: relu(edge @ W1[:F_E] + proj1[src] + b1) ----------------------
    acc1 = jnp.dot(edge_ref[...], w1e_ref[...],
                   preferred_element_type=jnp.float32)           # (E, H1P)
    msg = jnp.maximum(acc1 + gathered + bias_ref[0:1, :H1P], 0.0)

    # ---- mean over incoming edges: 0/1 mask matmul + approx 1/deg (EUP) -----
    dst_row = dst_ref[...]                                       # (1, E) int32
    mask = lax.broadcasted_iota(jnp.int32, (N, E), 0) == dst_row  # (N, E) bool
    mask_bf = mask.astype(jnp.bfloat16)
    deg = jnp.sum(mask.astype(jnp.float32), axis=1, keepdims=True)   # (N, 1)
    inv_deg = jnp.where(deg > 0.0,
                        pl.reciprocal(jnp.maximum(deg, 1.0), approx=True),
                        0.0)                                     # 0 for deg==0
    summed = jnp.dot(mask_bf, msg.astype(jnp.bfloat16),
                     preferred_element_type=jnp.float32)         # (N, H1P)
    reduced = summed * inv_deg

    # ---- mlp2: relu(reduced @ W2[:H1] + proj2 + b2) -------------------------
    acc2 = jnp.dot(reduced.astype(jnp.bfloat16), w2r_ref[...],
                   preferred_element_type=jnp.float32)           # (N, HOP)
    out_ref[...] = jnp.maximum(acc2 + proj2 + bias_ref[1:2, :HOP],
                               0.0).astype(out_ref.dtype)


def _full_block(shape):
    zeros = (0,) * len(shape)
    return pl.BlockSpec(shape, lambda i: zeros)


def _round_up(x, m):
    return ((x + m - 1) // m) * m


def _pad2d(a, rows, cols):
    return jnp.pad(a, ((0, rows - a.shape[0]), (0, cols - a.shape[1])))


# ------------------------------ EdgeConv wrapper ------------------------------

def edgeconv_forward(edge_feat, hid, src, dst, params):
    """EdgeConv.forward on an explicit (src, dst, edge_feat, hid) graph."""
    W1, b1, W2, b2 = params
    N, H = hid.shape
    E, F_E = edge_feat.shape
    H1 = W1.shape[1]
    H_OUT = W2.shape[1]
    H1P = _round_up(max(H1, 128), 128)      # lane-dense mlp1 width
    HOP = _round_up(max(H_OUT, 128), 128)   # lane-dense output width
    BW = max(H1P, HOP)

    # Split the concat weights, zero-pad to lane-dense widths (exact: padded
    # columns stay 0 through bias-add and ReLU), bf16 operands / f32 accum.
    w1e = _pad2d(W1[:F_E], F_E, H1P).astype(jnp.bfloat16)        # (F_E, H1P)
    w1h = _pad2d(W1[F_E:], H, H1P).astype(jnp.bfloat16)          # (H,   H1P)
    w2r = _pad2d(W2[:H1], H1P, HOP).astype(jnp.bfloat16)         # (H1P, HOP)
    w2h = _pad2d(W2[H1:], H, HOP).astype(jnp.bfloat16)           # (H,   HOP)
    w_hid = jnp.concatenate([w1h, w2h], axis=1)                  # (H, H1P+HOP)
    biases = jnp.stack([jnp.pad(b1.astype(jnp.float32), (0, BW - H1)),
                        jnp.pad(b2.astype(jnp.float32), (0, BW - H_OUT))])

    edge_bf = edge_feat.astype(jnp.bfloat16)
    hid_bf = hid.astype(jnp.bfloat16)
    src2 = src.astype(jnp.int32).reshape(E, 1)
    dst2 = dst.astype(jnp.int32).reshape(1, E)

    flops = 2 * (N * H * (H1P + HOP)        # fused hid-side projection
                 + E * N * H1P              # one-hot gather of projected rows
                 + E * F_E * H1P            # mlp1 edge-feature matmul
                 + N * E * H1P              # mean-aggregation matmul
                 + N * H1P * HOP)           # mlp2 reduced matmul
    bytes_accessed = (2 * (edge_bf.size + hid_bf.size + w1e.size
                           + w_hid.size + w2r.size)
                      + 4 * (src2.size + dst2.size + biases.size)
                      + 4 * N * HOP)

    out_padded = pl.pallas_call(
        _edgeconv_fused_kernel,
        out_shape=jax.ShapeDtypeStruct((N, HOP), jnp.float32),
        grid=(1,),
        in_specs=[
            _full_block((E, 1)),             # src (column)
            _full_block((1, E)),             # dst (row)
            _full_block((E, F_E)),           # edge features
            _full_block((N, H)),             # node hid
            _full_block((F_E, H1P)),         # W1 edge part (lane-padded)
            _full_block((H, H1P + HOP)),     # fused hid-side weights
            _full_block((H1P, HOP)),         # W2 reduced part (lane-padded)
            _full_block((2, BW)),            # packed [b1; b2]
        ],
        out_specs=_full_block((N, HOP)),
        compiler_params=pltpu.CompilerParams(
            # TODO(synk): once E is tiled on a grid axis, mark it "parallel"
            # so the second v7x TensorCore is used.
            dimension_semantics=("arbitrary",),
            vmem_limit_bytes=32 * 1024 * 1024),
        cost_estimate=pl.CostEstimate(flops=flops, transcendentals=N,
                                      bytes_accessed=bytes_accessed),
    )(src2, dst2, edge_bf, hid_bf, w1e, w_hid, w2r, biases)

    return out_padded[:, :H_OUT]


# --------------------------------- reference ----------------------------------

def mean_agg_matrix(dst, num_nodes, num_edges):
    """Dense (N, E) mean matrix (reference only). Zero-in-degree rows are 0."""
    deg = jnp.zeros((num_nodes,), jnp.float32).at[dst].add(1.0)
    inv_deg = jnp.where(deg > 0, 1.0 / jnp.maximum(deg, 1.0), 0.0)
    onehot = jnp.zeros((num_nodes, num_edges), jnp.float32).at[
        dst, jnp.arange(num_edges)].set(1.0)
    return onehot * inv_deg[:, None]


# ----------------------------------- main --------------------------------------

if __name__ == "__main__":
    key = jax.random.PRNGKey(0)
    k1, k2, k3, k4, k5, k6, k7, k8 = jax.random.split(key, 8)

    N, E = 16, 64          # nodes, edges
    F_E, H = 16, 32        # edge feature dim, node hidden dim
    H1, H_OUT = 32, 32     # mlp1 out dim, mlp2 out dim

    edge_feat = jax.random.normal(k1, (E, F_E), jnp.float32)
    hid = jax.random.normal(k2, (N, H), jnp.float32)
    src = jax.random.randint(k3, (E,), 0, N)
    dst = jax.random.randint(k4, (E,), 0, N)

    # mlp1: Linear(F_E + H -> H1) + ReLU ; mlp2: Linear(H1 + H -> H_OUT) + ReLU
    W1 = 0.1 * jax.random.normal(k5, (F_E + H, H1), jnp.float32)
    b1 = 0.1 * jax.random.normal(k6, (H1,), jnp.float32)
    W2 = 0.1 * jax.random.normal(k7, (H1 + H, H_OUT), jnp.float32)
    b2 = 0.1 * jax.random.normal(k8, (H_OUT,), jnp.float32)

    out = edgeconv_forward(edge_feat, hid, src, dst, (W1, b1, W2, b2))
    jax.block_until_ready(out)

    # pure-JAX f32 reference (kernel uses bf16 matmul operands -> wide tol)
    ref_msg = jnp.maximum(
        jnp.concatenate([edge_feat, hid[src]], axis=1) @ W1 + b1, 0.0)
    ref_red = mean_agg_matrix(dst, N, E) @ ref_msg
    ref_out = jnp.maximum(
        jnp.concatenate([ref_red, hid], axis=1) @ W2 + b2, 0.0)
    assert out.shape == ref_out.shape
    assert jnp.allclose(out, ref_out, atol=5e-2, rtol=5e-2), (
        float(jnp.max(jnp.abs(out - ref_out))))

    print("KERNEL_OK")
</pallas_src>

<mosaic_0001>
module attributes {stable_mosaic.version = 11 : i64} {
  func.func @_edgeconv_fused_kernel(%arg0: i32, %arg1: memref<64x1xi32, #tpu.memory_space<vmem>>, %arg2: memref<1x64xi32, #tpu.memory_space<vmem>>, %arg3: memref<64x16xbf16, #tpu.memory_space<vmem>>, %arg4: memref<16x32xbf16, #tpu.memory_space<vmem>>, %arg5: memref<16x128xbf16, #tpu.memory_space<vmem>>, %arg6: memref<32x256xbf16, #tpu.memory_space<vmem>>, %arg7: memref<128x128xbf16, #tpu.memory_space<vmem>>, %arg8: memref<2x128xf32, #tpu.memory_space<vmem>>, %arg9: memref<16x128xf32, #tpu.memory_space<vmem>>) attributes {dimension_semantics = [#tpu.dimension_semantics<arbitrary>], iteration_bounds = array<i64: 1>, scalar_prefetch = 0 : i64, scratch_operands = 0 : i64, tpu.core_type = #tpu.core_type<tc>, window_params = [{pipeline_mode = #tpu.pipeline_mode<synchronous>, transform_indices = @transform_0, window_bounds = array<i64: 64, 1>}, {pipeline_mode = #tpu.pipeline_mode<synchronous>, transform_indices = @transform_1, window_bounds = array<i64: 1, 64>}, {pipeline_mode = #tpu.pipeline_mode<synchronous>, transform_indices = @transform_2, window_bounds = array<i64: 64, 16>}, {pipeline_mode = #tpu.pipeline_mode<synchronous>, transform_indices = @transform_3, window_bounds = array<i64: 16, 32>}, {pipeline_mode = #tpu.pipeline_mode<synchronous>, transform_indices = @transform_4, window_bounds = array<i64: 16, 128>}, {pipeline_mode = #tpu.pipeline_mode<synchronous>, transform_indices = @transform_5, window_bounds = array<i64: 32, 256>}, {pipeline_mode = #tpu.pipeline_mode<synchronous>, transform_indices = @transform_6, window_bounds = array<i64: 128, 128>}, {pipeline_mode = #tpu.pipeline_mode<synchronous>, transform_indices = @transform_7, window_bounds = array<i64: 2, 128>}, {pipeline_mode = #tpu.pipeline_mode<synchronous>, transform_indices = @transform_8, window_bounds = array<i64: 16, 128>}]} {
    %c0 = arith.constant 0 : index
    %c0_0 = arith.constant 0 : index
    %0 = vector.load %arg4[%c0, %c0_0] : memref<16x32xbf16, #tpu.memory_space<vmem>>, vector<16x32xbf16>
    %c0_1 = arith.constant 0 : index
    %c0_2 = arith.constant 0 : index
    %1 = vector.load %arg6[%c0_1, %c0_2] : memref<32x256xbf16, #tpu.memory_space<vmem>>, vector<32x256xbf16>
    %cst = arith.constant dense<0.000000e+00> : vector<16x256xf32>
    %2 = tpu.matmul %0, %1, %cst {dimension_numbers = #tpu.dot_dimension_numbers<[1], [0], [0], [1], [0, 0, 1, 1], [], []>} : vector<16x32xbf16>, vector<32x256xbf16>, vector<16x256xf32> -> vector<16x256xf32>
    %3 = vector.extract_strided_slice %2 {offsets = [0, 0], sizes = [16, 128], strides = [1, 1]} : vector<16x256xf32> to vector<16x128xf32>
    %4 = vector.extract_strided_slice %2 {offsets = [0, 128], sizes = [16, 128], strides = [1, 1]} : vector<16x256xf32> to vector<16x128xf32>
    %c0_3 = arith.constant 0 : index
    %c0_4 = arith.constant 0 : index
    %5 = vector.load %arg1[%c0_3, %c0_4] : memref<64x1xi32, #tpu.memory_space<vmem>>, vector<64x1xi32>
    %6 = tpu.iota {dimensions = array<i32: 1>} : vector<64x16xi32>
    %7 = vector.broadcast %5 : vector<64x1xi32> to vector<64x16xi32>
    %8 = arith.cmpi eq, %6, %7 : vector<64x16xi32>
    %9 = arith.extui %8 : vector<64x16xi1> to vector<64x16xi32>
    %10 = arith.sitofp %9 : vector<64x16xi32> to vector<64x16xf32>
    %11 = arith.truncf %10 : vector<64x16xf32> to vector<64x16xbf16>
    %12 = arith.truncf %3 : vector<16x128xf32> to vector<16x128xbf16>
    %cst_5 = arith.constant dense<0.000000e+00> : vector<64x128xf32>
    %13 = tpu.matmul %11, %12, %cst_5 {dimension_numbers = #tpu.dot_dimension_numbers<[1], [0], [0], [1], [0, 0, 1, 1], [], []>} : vector<64x16xbf16>, vector<16x128xbf16>, vector<64x128xf32> -> vector<64x128xf32>
    %c0_6 = arith.constant 0 : index
    %c0_7 = arith.constant 0 : index
    %14 = vector.load %arg3[%c0_6, %c0_7] : memref<64x16xbf16, #tpu.memory_space<vmem>>, vector<64x16xbf16>
    %c0_8 = arith.constant 0 : index
    %c0_9 = arith.constant 0 : index
    %15 = vector.load %arg5[%c0_8, %c0_9] : memref<16x128xbf16, #tpu.memory_space<vmem>>, vector<16x128xbf16>
    %cst_10 = arith.constant dense<0.000000e+00> : vector<64x128xf32>
    %16 = tpu.matmul %14, %15, %cst_10 {dimension_numbers = #tpu.dot_dimension_numbers<[1], [0], [0], [1], [0, 0, 1, 1], [], []>} : vector<64x16xbf16>, vector<16x128xbf16>, vector<64x128xf32> -> vector<64x128xf32>
    %17 = arith.addf %16, %13 : vector<64x128xf32>
    %c0_11 = arith.constant 0 : index
    %c0_12 = arith.constant 0 : index
    %18 = vector.load %arg8[%c0_11, %c0_12] : memref<2x128xf32, #tpu.memory_space<vmem>>, vector<1x128xf32>
    %19 = vector.broadcast %18 : vector<1x128xf32> to vector<64x128xf32>
    %20 = arith.addf %17, %19 : vector<64x128xf32>
    %cst_13 = arith.constant 0.000000e+00 : f32
    %21 = vector.broadcast %cst_13 : f32 to vector<64x128xf32>
    %22 = arith.maximumf %20, %21 : vector<64x128xf32>
    %c0_14 = arith.constant 0 : index
    %c0_15 = arith.constant 0 : index
    %23 = vector.load %arg2[%c0_14, %c0_15] : memref<1x64xi32, #tpu.memory_space<vmem>>, vector<1x64xi32>
    %24 = tpu.iota {dimensions = array<i32: 0>} : vector<16x64xi32>
    %25 = vector.broadcast %23 : vector<1x64xi32> to vector<16x64xi32>
    %26 = arith.cmpi eq, %24, %25 : vector<16x64xi32>
    %27 = arith.extui %26 : vector<16x64xi1> to vector<16x64xi32>
    %28 = arith.sitofp %27 : vector<16x64xi32> to vector<16x64xf32>
    %29 = arith.truncf %28 : vector<16x64xf32> to vector<16x64xbf16>
    %30 = arith.extui %26 : vector<16x64xi1> to vector<16x64xi32>
    %31 = arith.sitofp %30 : vector<16x64xi32> to vector<16x64xf32>
    %cst_16 = arith.constant dense<0.000000e+00> : vector<16xf32>
    %32 = vector.multi_reduction <add>, %31, %cst_16 [1] : vector<16x64xf32> to vector<16xf32>
    %33 = vector.shape_cast %32 : vector<16xf32> to vector<16x1xf32>
    %cst_17 = arith.constant 0.000000e+00 : f32
    %34 = vector.broadcast %cst_17 : f32 to vector<16x1xf32>
    %35 = arith.cmpf ogt, %33, %34 : vector<16x1xf32>
    %cst_18 = arith.constant 1.000000e+00 : f32
    %36 = vector.broadcast %cst_18 : f32 to vector<16x1xf32>
    %37 = arith.maximumf %33, %36 : vector<16x1xf32>
    %38 = tpu.reciprocal %37 {approx = true} : vector<16x1xf32> -> vector<16x1xf32>
    %cst_19 = arith.constant 0.000000e+00 : f32
    %39 = vector.broadcast %cst_19 : f32 to vector<16x1xf32>
    %40 = arith.select %35, %38, %39 : vector<16x1xi1>, vector<16x1xf32>
    %41 = arith.truncf %22 : vector<64x128xf32> to vector<64x128xbf16>
    %cst_20 = arith.constant dense<0.000000e+00> : vector<16x128xf32>
    %42 = tpu.matmul %29, %41, %cst_20 {dimension_numbers = #tpu.dot_dimension_numbers<[1], [0], [0], [1], [0, 0, 1, 1], [], []>} : vector<16x64xbf16>, vector<64x128xbf16>, vector<16x128xf32> -> vector<16x128xf32>
    %43 = vector.broadcast %40 : vector<16x1xf32> to vector<16x128xf32>
    %44 = arith.mulf %42, %43 : vector<16x128xf32>
    %45 = arith.truncf %44 : vector<16x128xf32> to vector<16x128xbf16>
    %c0_21 = arith.constant 0 : index
    %c0_22 = arith.constant 0 : index
    %46 = vector.load %arg7[%c0_21, %c0_22] : memref<128x128xbf16, #tpu.memory_space<vmem>>, vector<128x128xbf16>
    %cst_23 = arith.constant dense<0.000000e+00> : vector<16x128xf32>
    %47 = tpu.matmul %45, %46, %cst_23 {dimension_numbers = #tpu.dot_dimension_numbers<[1], [0], [0], [1], [0, 0, 1, 1], [], []>} : vector<16x128xbf16>, vector<128x128xbf16>, vector<16x128xf32> -> vector<16x128xf32>
    %48 = arith.addf %47, %4 : vector<16x128xf32>
    %c1 = arith.constant 1 : index
    %c0_24 = arith.constant 0 : index
    %49 = vector.load %arg8[%c1, %c0_24] : memref<2x128xf32, #tpu.memory_space<vmem>>, vector<1x128xf32>
    %50 = vector.broadcast %49 : vector<1x128xf32> to vector<16x128xf32>
    %51 = arith.addf %48, %50 : vector<16x128xf32>
    %cst_25 = arith.constant 0.000000e+00 : f32
    %52 = vector.broadcast %cst_25 : f32 to vector<16x128xf32>
    %53 = arith.maximumf %51, %52 : vector<16x128xf32>
    %c0_26 = arith.constant 0 : index
    %c0_27 = arith.constant 0 : index
    %54 = vector.load %arg9[%c0_26, %c0_27] : memref<16x128xf32, #tpu.memory_space<vmem>>, vector<16x128xf32>
    tpu.vector_store %arg9[%c0_26, %c0_27], %53 {strides = array<i32>} : memref<16x128xf32, #tpu.memory_space<vmem>>, vector<16x128xf32>,
    return
  }
  func.func @transform_0(%arg0: i32) -> (i32, i32) {
    %c0_i32 = arith.constant 0 : i32
    %c0_i32_0 = arith.constant 0 : i32
    %c0_i32_1 = arith.constant 0 : i32
    return %c0_i32, %c0_i32_0 : i32, i32
  }
  func.func @transform_1(%arg0: i32) -> (i32, i32) {
    %c0_i32 = arith.constant 0 : i32
    %c0_i32_0 = arith.constant 0 : i32
    %c0_i32_1 = arith.constant 0 : i32
    return %c0_i32, %c0_i32_0 : i32, i32
  }
  func.func @transform_2(%arg0: i32) -> (i32, i32) {
    %c0_i32 = arith.constant 0 : i32
    %c0_i32_0 = arith.constant 0 : i32
    %c0_i32_1 = arith.constant 0 : i32
    return %c0_i32, %c0_i32_0 : i32, i32
  }
  func.func @transform_3(%arg0: i32) -> (i32, i32) {
    %c0_i32 = arith.constant 0 : i32
    %c0_i32_0 = arith.constant 0 : i32
    %c0_i32_1 = arith.constant 0 : i32
    return %c0_i32, %c0_i32_0 : i32, i32
  }
  func.func @transform_4(%arg0: i32) -> (i32, i32) {
    %c0_i32 = arith.constant 0 : i32
    %c0_i32_0 = arith.constant 0 : i32
    %c0_i32_1 = arith.constant 0 : i32
    return %c0_i32, %c0_i32_0 : i32, i32
  }
  func.func @transform_5(%arg0: i32) -> (i32, i32) {
    %c0_i32 = arith.constant 0 : i32
    %c0_i32_0 = arith.constant 0 : i32
    %c0_i32_1 = arith.constant 0 : i32
    return %c0_i32, %c0_i32_0 : i32, i32
  }
  func.func @transform_6(%arg0: i32) -> (i32, i32) {
    %c0_i32 = arith.constant 0 : i32
    %c0_i32_0 = arith.constant 0 : i32
    %c0_i32_1 = arith.constant 0 : i32
    return %c0_i32, %c0_i32_0 : i32, i32
  }
  func.func @transform_7(%arg0: i32) -> (i32, i32) {
    %c0_i32 = arith.constant 0 : i32
    %c0_i32_0 = arith.constant 0 : i32
    %c0_i32_1 = arith.constant 0 : i32
    return %c0_i32, %c0_i32_0 : i32, i32
  }
  func.func @transform_8(%arg0: i32) -> (i32, i32) {
    %c0_i32 = arith.constant 0 : i32
    %c0_i32_0 = arith.constant 0 : i32
    %c0_i32_1 = arith.constant 0 : i32
    return %c0_i32, %c0_i32_0 : i32, i32
  }
}

</mosaic_0001>

<bundles_post_ra>
// kernel: tpu_custom_call.1
= control target key start
LH: loop header
LB: loop body
LE: loop exit
PB: predicated region body
PF: predicated region fallthrough
CT: control target
= control target key end

     0   :  { %13 = vsyncpa [#allocation3], 0  ;;  %s822_s0 = inlined_call_operand.vmem [shape: s32[64,1], index: 0, kind: input, shape index: {}]   ;;  %s823_s1 = inlined_call_operand.vmem [shape: s32[1,64], index: 1, kind: input, shape index: {}]   ;;  %s824_s2 = inlined_call_operand.vmem [shape: bf16[64,16], index: 2, kind: input, shape index: {}]   ;;  %s825_s3 = inlined_call_operand.vmem [shape: bf16[16,32], index: 3, kind: input, shape index: {}]   ;;  %s826_s4 = inlined_call_operand.hbm [shape: bf16[16,128], index: 4, kind: input, shape index: {}]   ;;  %s827_s5 = inlined_call_operand.vmem [shape: bf16[32,256], index: 5, kind: input, shape index: {}]   ;;  %s828_s6 = inlined_call_operand.vmem [shape: bf16[128,128], index: 6, kind: input, shape index: {}]   ;;  %s829_s7 = inlined_call_operand.vmem [shape: f32[2,128], index: 7, kind: input, shape index: {}]   ;;  %s830_s8 = inlined_call_operand.hbm [shape: f32[16,128], index: 8, kind: output, shape index: {}]  }
   0x1   :  { %14 = vsyncpa [#allocation4], 0  ;;  %s27_s29 = sshll.u32 %s826_s4, 4  ;;  %s647_s30 = smov [#allocation2]   ;;  %s28_s29 = int_to_ptr.hbm [resolvable:$true] %s27_s29 }
   0x2   :  { %s29_s9 = sshll.u32 %s647_s30, 4  ;;  %s648_s10 = smov 64   ;;  %s30_s9 = int_to_ptr.vmem [resolvable:$true] %s29_s9 }
   0x3   :  { %s649_s11 = smov 4  }
   0x4   :  { %35 = dma.hbm_to_vmem [thread:$0]  %s28_s29, 128, %s30_s9, [#allocation3], %s648_s10, %s648_s10, %s649_s11  }
   0x5   :  { %643 = dma.done.wait [#allocation3], 128  }
   0x6   :  { %644 = vsyncadd [#allocation3], 4294967168  ;;  %v650_v0 = vmov 0   ;;  %v480_v1 = vld [vmem:[%s827_s5 + $0x10] sm:$0xf]  ;;  %v110_v5 = vld [vmem:[%s822_s0] sm:$0xff]  ;;  %v118_v20 = vlaneseq }
   0x7   :  { %586 = vset.pattern.permute.xlu1 %v650_v0  ;;  %585 = vset.pattern.permute.xlu0 %v650_v0  ;;  %v563_v2 = vld [vmem:[%s827_s5 + $0x14] sm:$0xf0]  ;;  %v112_v3 = vld [vmem:[%s822_s0 + $0x10] sm:$0xff]  ;;  %v472_v6 = vld [vmem:[%s827_s5] sm:$0xf]  ;;  %vm78_vm0 = vcmask 261120  }
   0x8   :  { %587 = vset.pattern.permute.xlu2 %v650_v0  ;;  %v481_v4 = vor.u32 %v563_v2, %v480_v1  ;;  %127 = vperm.xlu1 %586, %v112_v3   ;;  %v561_v7 = vld [vmem:[%s827_s5 + $0x4] sm:$0xf0]  ;;  %v114_v9 = vld [vmem:[%s822_s0 + $0x20] sm:$0xff]  ;;  %v113_v11 = vld [vmem:[%s822_s0 + $0x18] sm:$0xff]  ;;  %vm173_vm1 = vcmask 130048   ;;  %v119_v23 = vand.u32 127, %v118_v20 }
   0x9   :  { %121 = vperm.xlu0 %585, %v110_v5   ;;  %v473_v8 = vor.u32 %v561_v7, %v472_v6  ;;  %133 = vperm.xlu2 %587, %v114_v9   ;;  %v727_v10 = vld [vmem:[%s825_s3] sm:$0xff]  ;;  %v111_v12 = vld [vmem:[%s822_s0 + $0x8] sm:$0xff]  ;;  %v117_v14 = vld [vmem:[%s822_s0 + $0x38] sm:$0xff]  ;;  %v651_v26 = vmov 0.0   ;;  %v312_v60 = vshrl.u32 %v118_v20, 7  ;;  %vm322_vm12 = vcmask 523264  }
   0xa   :  { %88 = vmatpush.bf16.msra.mxu0 %v481_v4  ;;  %v115_v13 = vld [vmem:[%s822_s0 + $0x28] sm:$0xff]  ;;  %v116_v15 = vld [vmem:[%s822_s0 + $0x30] sm:$0xff]  ;;  %v568_v16 = vld [vmem:[#allocation2] sm:$0xff]  ;;  %s652_s20 = smov [#allocation5]   ;;  %s453_s24 = sshll.u32 %s830_s8, 4  ;;  %s454_s24 = int_to_ptr.hbm [resolvable:$true] %s453_s24 }
   0xb   :  { %v564_v17 = vld [vmem:[%s824_s2] sm:$0xff]  ;;  %270 = vmatpush.bf16.msra.mxu3 %v568_v16  ;;  %v565_v18 = vld [vmem:[%s824_s2 + $0x8] sm:$0xff]  ;;  %v566_v22 = vld [vmem:[%s824_s2 + $0x10] sm:$0xff]  ;;  %v313_v61 = vadd.s32 8, %v312_v60  ;;  %s451_s21 = sshll.u32 %s652_s20, 4  ;;  %s452_s21 = int_to_ptr.vmem [resolvable:$true] %s451_s21 }
   0xc   :  { %v567_v32 = vld [vmem:[%s824_s2 + $0x18] sm:$0xff]  ;;  %v589_v62 = vld [vmem:[%s823_s1] ss:$0 sm:$0xff]  ;;  %v562_v5 = vld [vmem:[%s827_s5 + $0x14] sm:$0xf]  ;;  %s653_s1 = smov 128  }
   0xd   :  { %vm315_vm10 = vcmp.eq.s32.totalorder %v312_v60, %v589_v62  ;;  %vm316_vm11 = vcmp.eq.s32.totalorder %v313_v61, %v589_v62  ;;  %v482_v6 = vld [vmem:[%s827_s5 + $0x18] sm:$0xf0]  ;;  %v560_v7 = vld [vmem:[%s827_s5 + $0x4] sm:$0xf]  ;;  %v474_v9 = vld [vmem:[%s827_s5 + $0x8] sm:$0xf0] }
   0xe   :  { %89 = vmatpush.bf16.msra.mxu0 %v473_v8  ;;  %520 = vmatmul.msk.bf16.vlgmr.msra.gmra.mxu3 %vm173_vm1, %v564_v17  ;;  %v524_v63 = vsel %vm315_vm10, 1.0, %v651_v26  ;;  %v525_v0 = vsel %vm316_vm11, 1.0, %v651_v26  ;;  %v485_v8 = vor.u32 %v562_v5, %v482_v6 }
   0xf   :  { %v323_v2 = vsel %vm322_vm12, %v524_v63, 0.0  ;;  %v326_v3 = vsel %vm322_vm12, %v525_v0, 0.0 }
  0x10   :  { %130 = vperm.xlu1 %586, %v113_v11   ;;  %102 = vmatpush.bf16.msra.mxu1 %v485_v8  ;;  %v477_v11 = vor.u32 %v560_v7, %v474_v9 }
  0x11   :  { %486 = vmatmul.msk.bf16.vlgmr.msra.gmra.mxu0 %vm78_vm0, %v727_v10  ;;  %124 = vperm.xlu0 %585, %v111_v12   ;;  %v576_v12 = vld [vmem:[%s828_s6 + $0x38] sm:$0xff] }
  0x12   :  { %136 = vperm.xlu2 %587, %v115_v13  }
  0x14   :  { %103 = vmatpush.bf16.msra.mxu1 %v477_v11 }
  0x17   :  { %487 = vmatmul.msk.bf16.vlgmr.msra.gmra.mxu1 %vm78_vm0, %v727_v10 }
  0x18   :  { %142 = vperm.xlu1 %586, %v117_v14   ;;  %v588_v14 = vld [vmem:[%s829_s7] ss:$0 sm:$0xff]  ;;  %425 = vmatpush.bf16.msrb.mxu1 %v576_v12 }
  0x19   :  { %139 = vperm.xlu0 %585, %v116_v15  }
  0x1e   :  { %521 = vmatmul.msk.bf16.gmra.mxu3 %vm173_vm1, %v565_v18  ;;  %v575_v18 = vld [vmem:[%s828_s6 + $0x30] sm:$0xff] }
  0x1f   :  { %426 = vmatpush.bf16.msrb.mxu1 %v575_v18 }
  0x2e   :  { %522 = vmatmul.msk.bf16.gmra.mxu3 %vm173_vm1, %v566_v22 }
  0x3b   :  { %324 = vadd.xlane.f32.xlu2 %v323_v2 }
  0x3e   :  { %523 = vmatmul.msk.bf16.gmra.mxu3 %vm173_vm1, %v567_v32 }
  0x43   :  { %327 = vadd.xlane.f32.xlu0 %v326_v3 }
  0x63   :  { %v134_v36 = vpop.permute.xlu2 %133 }
  0x64   :  { %vm148_vm6 = vcmp.eq.s32.totalorder %v119_v23, %v134_v36 }
  0x65   :  { %v492_v39 = vsel %vm148_vm6, 1.0, %v651_v26 }
  0x6c   :  { %v137_v38 = vpop.permute.xlu2 %136 }
  0x6d   :  { %vm149_vm7 = vcmp.eq.s32.totalorder %v119_v23, %v137_v38 }
  0x6e   :  { %v493_v40 = vsel %vm149_vm7, 1.0, %v651_v26 }
  0x6f   :  { %v170_v41 = vpack.c.bf16 %v493_v40, %v492_v39 }
  0x7a   :  { %v128_v30 = vpop.permute.xlu1 %127 }
  0x7b   :  { %v122_v19 = vpop.permute.xlu0 %121  ;;  %vm146_vm4 = vcmp.eq.s32.totalorder %v119_v23, %v128_v30 }
  0x7c   :  { %vm144_vm2 = vcmp.eq.s32.totalorder %v119_v23, %v122_v19  ;;  %v490_v34 = vsel %vm146_vm4, 1.0, %v651_v26 }
  0x7d   :  { %v488_v27 = vsel %vm144_vm2, 1.0, %v651_v26 }
  0x82   :  { %v131_v33 = vpop.permute.xlu1 %130 }
  0x83   :  { %v125_v24 = vpop.permute.xlu0 %124  ;;  %vm147_vm5 = vcmp.eq.s32.totalorder %v119_v23, %v131_v33 }
  0x84   :  { %vm145_vm3 = vcmp.eq.s32.totalorder %v119_v23, %v125_v24  ;;  %v491_v35 = vsel %vm147_vm5, 1.0, %v651_v26 }
  0x85   :  { %v489_v28 = vsel %vm145_vm3, 1.0, %v651_v26  ;;  %v169_v37 = vpack.c.bf16 %v491_v35, %v490_v34 }
  0x86   :  { %v168_v31 = vpack.c.bf16 %v489_v28, %v488_v27 }
  0x8a   :  { %v143_v42 = vpop.permute.xlu1 %142 }
  0x8b   :  { %v140_v43 = vpop.permute.xlu0 %139  ;;  %vm151_vm8 = vcmp.eq.s32.totalorder %v119_v23, %v143_v42 }
  0x8c   :  { %vm150_vm9 = vcmp.eq.s32.totalorder %v119_v23, %v140_v43  ;;  %v495_v44 = vsel %vm151_vm8, 1.0, %v651_v26 }
  0x8d   :  { %v494_v45 = vsel %vm150_vm9, 1.0, %v651_v26 }
  0x8e   :  { %v91_v21 = vpop.f32.mrf.mxu0  ;;  %v171_v46 = vpack.c.bf16 %v495_v44, %v494_v45  ;;  %v321_v44 = vpack.c.bf16 %v525_v0, %v524_v63  ;;  %v573_v45 = vld [vmem:[%s828_s6 + $0x20] sm:$0xff] }
  0x91   :  { %v272_v47 = vpop.f32.mrf.mxu3 }
  0x94   :  { %v105_v63 = vpop.f32.mrf.mxu1 }
  0x96   :  { %v93_v25 = vpop.f32.mrf.mxu0 }
  0x97   :  { %v172_v29 = vpack.c.bf16 %v93_v25, %v91_v21  ;;  %v574_v25 = vld [vmem:[%s828_s6 + $0x28] sm:$0xff] }
  0x98   :  { %427 = vmatpush.bf16.msrb.mxu1 %v574_v25 }
  0x99   :  { %193 = vmatpush.bf16.msra.mxu2 %v172_v29  ;;  %v274_v48 = vpop.f32.mrf.mxu3 }
  0x9c   :  { %496 = vmatmul.msk.bf16.vlgmr.msra.gmra.mxu2 %vm173_vm1, %v168_v31  ;;  %428 = vmatpush.bf16.msrb.mxu1 %v573_v45  ;;  %v107_v0 = vpop.f32.mrf.mxu1 }
  0xa1   :  { %v277_v51 = vpop.f32.mrf.mxu3 }
  0xa9   :  { %v279_v54 = vpop.f32.mrf.mxu3 }
  0xac   :  { %497 = vmatmul.msk.bf16.gmra.mxu2 %vm173_vm1, %v169_v37 }
  0xb1   :  { %v282_v56 = vpop.f32.mrf.mxu3 }
  0xb9   :  { %v284_v58 = vpop.f32.mrf.mxu3 }
  0xbc   :  { %498 = vmatmul.msk.bf16.gmra.mxu2 %vm173_vm1, %v170_v41 }
  0xc1   :  { %v287_v1 = vpop.f32.mrf.mxu3 }
  0xc9   :  { %v289_v16 = vpop.f32.mrf.mxu3 }
  0xcc   :  { %499 = vmatmul.msk.bf16.gmra.mxu2 %vm173_vm1, %v171_v46  ;;  %v572_v46 = vld [vmem:[%s828_s6 + $0x18] sm:$0xff] }
  0xcd   :  { %429 = vmatpush.bf16.msrb.mxu1 %v572_v46 }
 0x11f   :  { %v195_v49 = vpop.f32.mrf.mxu2 }
 0x120   :  { %v766_v50 = vadd.f32 %v272_v47, %v195_v49  ;;  %v571_v47 = vld [vmem:[%s828_s6 + $0x10] sm:$0xff]  ;;  %v569_v49 = vld [vmem:[%s828_s6] sm:$0xff] }
 0x121   :  { %430 = vmatpush.bf16.msrb.mxu1 %v571_v47 }
 0x122   :  { %v294_v38 = vadd.f32 %v588_v14, %v766_v50  ;;  %v325_v50 = vpop.xlane.xlu2 %324 }
 0x123   :  { %vm329_vm13 = vcmp.gt.f32.partialorder %v325_v50, 0.0 }
 0x124   :  { %v302_v42 = vmax.f32 %v294_v38, 0.0 }
 0x127   :  { %v197_v52 = vpop.f32.mrf.mxu2 }
 0x128   :  { %v275_v30 = vadd.f32 %v274_v48, %v197_v52  ;;  %v570_v48 = vld [vmem:[%s828_s6 + $0x8] sm:$0xff]  ;;  %v331_v52 = vmax.f32 %v325_v50, 1.0 }
 0x129   :  { %431 = vmatpush.bf16.msrb.mxu1 %v570_v48 }
 0x12a   :  { %v295_v10 = vadd.f32 %v588_v14, %v275_v30  ;;  %591 = vrcp.f32 %v331_v52 }
 0x12c   :  { %v303_v40 = vmax.f32 %v295_v10, 0.0 }
 0x12d   :  { %432 = vmatpush.bf16.msrb.mxu1 %v569_v49 }
 0x12e   :  { %v337_v43 = vpack.c.bf16 %v303_v40, %v302_v42 }
 0x12f   :  { %v200_v53 = vpop.f32.mrf.mxu2 }
 0x130   :  { %v278_v26 = vadd.f32 %v277_v51, %v200_v53  ;;  %v328_v51 = vpop.xlane.xlu0 %327 }
 0x131   :  { %v332_v53 = vmax.f32 %v328_v51, 1.0  ;;  %vm330_vm14 = vcmp.gt.f32.partialorder %v328_v51, 0.0 }
 0x132   :  { %v296_v34 = vadd.f32 %v588_v14, %v278_v26 }
 0x133   :  { %593 = vrcp.f32 %v332_v53 }
 0x134   :  { %v304_v39 = vmax.f32 %v296_v34, 0.0 }
 0x137   :  { %v202_v55 = vpop.f32.mrf.mxu2 }
 0x138   :  { %v280_v22 = vadd.f32 %v279_v54, %v202_v55  ;;  %v592_v55 = vpop.eup %591 }
 0x13a   :  { %v297_v31 = vadd.f32 %v588_v14, %v280_v22 }
 0x13c   :  { %v305_v36 = vmax.f32 %v297_v31, 0.0 }
 0x13e   :  { %v338_v41 = vpack.c.bf16 %v305_v36, %v304_v39 }
 0x13f   :  { %v205_v57 = vpop.f32.mrf.mxu2 }
 0x140   :  { %v283_v19 = vadd.f32 %v282_v56, %v205_v57  ;;  %v594_v56 = vpop.eup %593  ;;  %v335_v57 = vsel %vm329_vm13, %v592_v55, 0.0 }
 0x142   :  { %v298_v27 = vadd.f32 %v588_v14, %v283_v19 }
 0x144   :  { %v306_v35 = vmax.f32 %v298_v27, 0.0 }
 0x147   :  { %v207_v59 = vpop.f32.mrf.mxu2 }
 0x148   :  { %v285_v15 = vadd.f32 %v284_v58, %v207_v59  ;;  %v336_v58 = vsel %vm330_vm14, %v594_v56, 0.0 }
 0x14a   :  { %v299_v23 = vadd.f32 %v588_v14, %v285_v15 }
 0x14c   :  { %v307_v32 = vmax.f32 %v299_v23, 0.0 }
 0x14e   :  { %v339_v37 = vpack.c.bf16 %v307_v32, %v306_v35 }
 0x14f   :  { %v210_v4 = vpop.f32.mrf.mxu2 }
 0x150   :  { %v288_v13 = vadd.f32 %v287_v1, %v210_v4  ;;  %v590_v1 = vld [vmem:[%s829_s7 + $0x1] ss:$0 sm:$0xff]  ;;  %s654_s7 = smov 8  }
 0x152   :  { %v300_v20 = vadd.f32 %v588_v14, %v288_v13 }
 0x154   :  { %v308_v28 = vmax.f32 %v300_v20, 0.0 }
 0x157   :  { %v212_v17 = vpop.f32.mrf.mxu2 }
 0x158   :  { %v290_v21 = vadd.f32 %v289_v16, %v212_v17 }
 0x15a   :  { %v301_v24 = vadd.f32 %v588_v14, %v290_v21 }
 0x15c   :  { %v309_v29 = vmax.f32 %v301_v24, 0.0 }
 0x15e   :  { %v340_v33 = vpack.c.bf16 %v309_v29, %v308_v28 }
 0x160   :  { %348 = vmatpush.bf16.msrb.mxu0 %v340_v33 }
 0x164   :  { %349 = vmatpush.bf16.msrb.mxu0 %v339_v37 }
 0x168   :  { %350 = vmatpush.bf16.msrb.mxu0 %v338_v41 }
 0x16c   :  { %351 = vmatpush.bf16.msrb.mxu0 %v337_v43 }
 0x16f   :  { %526 = vmatmul.msk.bf16.vlgmr.msrb.gmra.mxu0 %vm322_vm12, %v321_v44 }
 0x1ec   :  { %v353_v54 = vpop.f32.mrf.mxu0 }
 0x1ed   :  { %v358_v60 = vmul.f32 %v353_v54, %v335_v57 }
 0x1f4   :  { %v355_v59 = vpop.f32.mrf.mxu0 }
 0x1f5   :  { %v359_v61 = vmul.f32 %v355_v59, %v336_v58 }
 0x1f7   :  { %v360_v62 = vpack.c.bf16 %v359_v61, %v358_v60 }
 0x1f9   :  { %433 = vmatmul.bf16.vlgmr.msrb.gmra.mxu1 %v360_v62 }
 0x276   :  { %v434_v2 = vpop.f32.mrf.mxu1 }
 0x277   :  { %v435_v3 = vadd.f32 %v434_v2, %v105_v63 }
 0x279   :  { %v441_v4 = vadd.f32 %v590_v1, %v435_v3 }
 0x27b   :  { %v443_v5 = vmax.f32 %v441_v4, 0.0 }
 0x27d   :  { %445 = vst [vmem:[#allocation5] sm:$0xff] %v443_v5 }
 0x27e   :  { %v436_v6 = vpop.f32.mrf.mxu1 }
 0x27f   :  { %v437_v7 = vadd.f32 %v436_v6, %v107_v0 }
 0x281   :  { %v442_v8 = vadd.f32 %v590_v1, %v437_v7 }
 0x283   :  { %v444_v9 = vmax.f32 %v442_v8, 0.0 }
 0x285   :  { %446 = vst [vmem:[#allocation5 + $0x8] sm:$0xff] %v444_v9 }
 0x286   :  { %459 = dma.vmem_to_hbm [thread:$0]  %s452_s21, 256, %s454_s24, [#allocation4], %s653_s1, %s653_s1, %s654_s7  }
 0x287   :  { %645 = dma.done.wait [#allocation4], 256  }
 0x288   :  { %646 = vsyncadd [#allocation4], 4294967040 }
 0x289   :  { %464 = vsyncpa [#allocation3], 1 }
 0x28a   :  { %465 = vsyncpa [#allocation4], 1 }

</bundles_post_ra>
